<compile_context>
chip_gen: v7x
topology: tpu7x:2x2x1
jax: 0.10.0
libtpu: 0.0.40
codegen_flags: <defaults>
</compile_context>

<pallas_src>
import jax
import jax.numpy as jnp
from jax.experimental import pallas as pl
from jax.experimental.pallas import tpu as pltpu


# ----------------------------- Pallas kernel ------------------------------ #
def _dist_kernel(hidx_ref, ridx_ref, tidx_ref, htab_ref, rtab_ref, ttab_ref,
                 o_ref):
    # Index rows for this tile: (1, T) int32, rows along the lane axis.
    hid = hidx_ref[...]
    rid = ridx_ref[...]
    tid = tidx_ref[...]
    tile = hid.shape[1]

    # Activated, transposed tables: (D, V) f32, resident in VMEM.
    _, v_ent = htab_ref.shape
    v_rel = rtab_ref.shape[1]

    # In-kernel gather: build a one-hot (V, T) from an iota along sublanes and
    # contract it against the (D, V) table on the MXU.  HIGHEST precision
    # keeps the one-hot row-pick bit-exact in f32.
    ent_iota = jax.lax.broadcasted_iota(jnp.int32, (v_ent, tile), 0)
    rel_iota = jax.lax.broadcasted_iota(jnp.int32, (v_rel, tile), 0)
    oh_h = (ent_iota == hid).astype(jnp.float32)
    oh_t = (ent_iota == tid).astype(jnp.float32)
    oh_r = (rel_iota == rid).astype(jnp.float32)

    h = jnp.dot(htab_ref[...], oh_h, precision=jax.lax.Precision.HIGHEST,
                preferred_element_type=jnp.float32)            # (D, T)
    r = jnp.dot(rtab_ref[...], oh_r, precision=jax.lax.Precision.HIGHEST,
                preferred_element_type=jnp.float32)            # (D, T)
    t = jnp.dot(ttab_ref[...], oh_t, precision=jax.lax.Precision.HIGHEST,
                preferred_element_type=jnp.float32)            # (D, T)

    # torch.norm(x, p=2, dim=1) -> sqrt(sum(x*x)) over the embedding dim
    # (sublane axis in this layout).
    nh = jnp.sqrt(jnp.sum(h * h, axis=0, keepdims=True))
    nr = jnp.sqrt(jnp.sum(r * r, axis=0, keepdims=True))
    nt = jnp.sqrt(jnp.sum(t * t, axis=0, keepdims=True))

    # (h*t).sum + (r*(t-h)).sum == sum(t*(h+r) - r*h): one reduce, not two.
    dots = jnp.sum(t * (h + r) - r * h, axis=0, keepdims=True)

    o_ref[...] = nh + nr + nt - 2.0 * dots                      # (1, T)


def _pick_tile(n):
    """Lane tile (rows live on lanes).  Prefer large, 128-multiple tiles with
    >= 2 grid steps (v7x megacore + unmasked stores); tiny batches fall back
    to a single full block."""
    for t in (2048, 1024, 512, 256, 128):
        if n >= 2 * t:
            return t
    return None


def transe_dist(h_idx, r_idx, t_idx, h_tab_t, r_tab_t, t_tab_t):
    """Scores N triples.  Tables are tanh-activated and transposed to (D, V)."""
    n = h_idx.shape[0]
    tile = _pick_tile(n)
    if tile is None:
        n_pad, tile = n, n                       # single full block
    else:
        n_pad = pl.cdiv(n, tile) * tile
    if n_pad != n:
        pad = n_pad - n                          # pad with index 0 (valid row)
        h_idx = jnp.pad(h_idx, (0, pad))
        r_idx = jnp.pad(r_idx, (0, pad))
        t_idx = jnp.pad(t_idx, (0, pad))

    h2 = h_idx.astype(jnp.int32).reshape(1, n_pad)
    r2 = r_idx.astype(jnp.int32).reshape(1, n_pad)
    t2 = t_idx.astype(jnp.int32).reshape(1, n_pad)

    d_dim, v_ent = h_tab_t.shape
    v_rel = r_tab_t.shape[1]
    grid = (n_pad // tile,)

    out = pl.pallas_call(
        _dist_kernel,
        out_shape=jax.ShapeDtypeStruct((1, n_pad), jnp.float32),
        grid_spec=pltpu.PrefetchScalarGridSpec(
            num_scalar_prefetch=0,
            grid=grid,
            in_specs=[
                pl.BlockSpec((1, tile), lambda i: (0, i)),
                pl.BlockSpec((1, tile), lambda i: (0, i)),
                pl.BlockSpec((1, tile), lambda i: (0, i)),
                pl.BlockSpec((d_dim, v_ent), lambda i: (0, 0)),
                pl.BlockSpec((d_dim, v_rel), lambda i: (0, 0)),
                pl.BlockSpec((d_dim, v_ent), lambda i: (0, 0)),
            ],
            out_specs=pl.BlockSpec((1, tile), lambda i: (0, i)),
        ),
        compiler_params=pltpu.CompilerParams(
            dimension_semantics=("parallel",)),
    )(h2, r2, t2, h_tab_t, r_tab_t, t_tab_t)
    return out.reshape(n_pad)[:n]


# ------------------------------- "Net" glue -------------------------------- #
class Net:
    """JAX/Pallas re-implementation of the PyTorch Net forward (act_fun=tanh)."""

    def __init__(self, dim, vocab_dim, relation_dim, key):
        self.d = dim
        kh, kr, kt = jax.random.split(key, 3)
        # nn.Embedding default init ~ N(0, 1)
        self.hl = jax.random.normal(kh, (vocab_dim, dim), dtype=jnp.float32)
        self.rl = jax.random.normal(kr, (relation_dim, dim), dtype=jnp.float32)
        self.tl = jax.random.normal(kt, (vocab_dim, dim), dtype=jnp.float32)
        # act_fun applied once to the tables (gather(tanh(T), i) ==
        # tanh(gather(T, i))) and pre-transposed to (D, V) for the
        # lane-oriented kernel layout.
        self.hl_act_t = jnp.tanh(self.hl).T
        self.rl_act_t = jnp.tanh(self.rl).T
        self.tl_act_t = jnp.tanh(self.tl).T

    def forward(self, x, x_):
        h, r, t = x
        h_, r_, t_ = x_
        b = h.shape[0]
        # Fuse positive + negative scoring into ONE kernel launch.
        h_all = jnp.concatenate([h, h_]).astype(jnp.int32)
        r_all = jnp.concatenate([r, r_]).astype(jnp.int32)
        t_all = jnp.concatenate([t, t_]).astype(jnp.int32)
        d_all = transe_dist(h_all, r_all, t_all,
                            self.hl_act_t, self.rl_act_t, self.tl_act_t)
        return d_all[:b], d_all[b:]

    __call__ = forward


# ------------------------------ reference ---------------------------------- #
def _reference(net, x, x_):
    def dist(h, r, t):
        h = jnp.tanh(h)
        r = jnp.tanh(r)
        t = jnp.tanh(t)
        res = (jnp.linalg.norm(h, axis=1)
               + jnp.linalg.norm(r, axis=1)
               + jnp.linalg.norm(t, axis=1))
        ht = (h * t).sum(axis=1)
        rth = (r * (t - h)).sum(axis=1)
        return res - 2.0 * (ht + rth)

    h, r, t = x
    h_, r_, t_ = x_
    p = dist(jnp.take(net.hl, h, 0), jnp.take(net.rl, r, 0), jnp.take(net.tl, t, 0))
    n = dist(jnp.take(net.hl, h_, 0), jnp.take(net.rl, r_, 0), jnp.take(net.tl, t_, 0))
    return p, n


if __name__ == "__main__":
    key = jax.random.PRNGKey(0)
    k_net, k1, k2, k3, k4, k5, k6 = jax.random.split(key, 7)

    DIM = 32            # embedding dim
    VOCAB_DIM = 50      # entity vocab size (stands in for len(index_to_word))
    RELATION_DIM = 10   # relation vocab size (stands in for len(index_to_relation))
    BATCH = 8           # number of triples per side

    # TODO(synk): the original script loads vocab/relation sizes from files
    # and takes act_fun as a constructor arg; here sizes are fixed constants
    # and act_fun is fixed to tanh.
    net = Net(DIM, VOCAB_DIM, RELATION_DIM, k_net)

    # positive triple indices
    h = jax.random.randint(k1, (BATCH,), 0, VOCAB_DIM, dtype=jnp.int32)
    r = jax.random.randint(k2, (BATCH,), 0, RELATION_DIM, dtype=jnp.int32)
    t = jax.random.randint(k3, (BATCH,), 0, VOCAB_DIM, dtype=jnp.int32)
    # negative (corrupted) triple indices
    h_ = jax.random.randint(k4, (BATCH,), 0, VOCAB_DIM, dtype=jnp.int32)
    r_ = jax.random.randint(k5, (BATCH,), 0, RELATION_DIM, dtype=jnp.int32)
    t_ = jax.random.randint(k6, (BATCH,), 0, VOCAB_DIM, dtype=jnp.int32)

    pos, neg = net((h, r, t), (h_, r_, t_))
    pos = jax.block_until_ready(pos)
    neg = jax.block_until_ready(neg)

    ref_pos, ref_neg = _reference(net, (h, r, t), (h_, r_, t_))
    assert pos.shape == (BATCH,) and neg.shape == (BATCH,)
    assert jnp.allclose(pos, ref_pos, atol=1e-5, rtol=1e-5)
    assert jnp.allclose(neg, ref_neg, atol=1e-5, rtol=1e-5)

    print("KERNEL_OK")
</pallas_src>

<mosaic_0001>
module attributes {stable_mosaic.version = 11 : i64} {
  func.func @_dist_kernel(%arg0: i32, %arg1: memref<1x16xi32, #tpu.memory_space<vmem>>, %arg2: memref<1x16xi32, #tpu.memory_space<vmem>>, %arg3: memref<1x16xi32, #tpu.memory_space<vmem>>, %arg4: memref<32x50xf32, #tpu.memory_space<vmem>>, %arg5: memref<32x10xf32, #tpu.memory_space<vmem>>, %arg6: memref<32x50xf32, #tpu.memory_space<vmem>>, %arg7: memref<1x16xf32, #tpu.memory_space<vmem>>) attributes {dimension_semantics = [#tpu.dimension_semantics<parallel>], iteration_bounds = array<i64: 1>, scalar_prefetch = 0 : i64, scratch_operands = 0 : i64, tpu.core_type = #tpu.core_type<tc>, window_params = [{transform_indices = @transform_0, window_bounds = array<i64: 1, 16>}, {transform_indices = @transform_1, window_bounds = array<i64: 1, 16>}, {transform_indices = @transform_2, window_bounds = array<i64: 1, 16>}, {pipeline_mode = #tpu.pipeline_mode<synchronous>, transform_indices = @transform_3, window_bounds = array<i64: 32, 50>}, {pipeline_mode = #tpu.pipeline_mode<synchronous>, transform_indices = @transform_4, window_bounds = array<i64: 32, 10>}, {pipeline_mode = #tpu.pipeline_mode<synchronous>, transform_indices = @transform_5, window_bounds = array<i64: 32, 50>}, {transform_indices = @transform_6, window_bounds = array<i64: 1, 16>}]} {
    %c0 = arith.constant 0 : index
    %c0_0 = arith.constant 0 : index
    %0 = vector.load %arg1[%c0, %c0_0] : memref<1x16xi32, #tpu.memory_space<vmem>>, vector<1x16xi32>
    %c0_1 = arith.constant 0 : index
    %c0_2 = arith.constant 0 : index
    %1 = vector.load %arg2[%c0_1, %c0_2] : memref<1x16xi32, #tpu.memory_space<vmem>>, vector<1x16xi32>
    %c0_3 = arith.constant 0 : index
    %c0_4 = arith.constant 0 : index
    %2 = vector.load %arg3[%c0_3, %c0_4] : memref<1x16xi32, #tpu.memory_space<vmem>>, vector<1x16xi32>
    %3 = tpu.iota {dimensions = array<i32: 0>} : vector<50x16xi32>
    %4 = tpu.iota {dimensions = array<i32: 0>} : vector<10x16xi32>
    %5 = vector.broadcast %0 : vector<1x16xi32> to vector<50x16xi32>
    %6 = arith.cmpi eq, %3, %5 : vector<50x16xi32>
    %7 = arith.extui %6 : vector<50x16xi1> to vector<50x16xi32>
    %8 = arith.sitofp %7 : vector<50x16xi32> to vector<50x16xf32>
    %9 = vector.broadcast %2 : vector<1x16xi32> to vector<50x16xi32>
    %10 = arith.cmpi eq, %3, %9 : vector<50x16xi32>
    %11 = arith.extui %10 : vector<50x16xi1> to vector<50x16xi32>
    %12 = arith.sitofp %11 : vector<50x16xi32> to vector<50x16xf32>
    %13 = vector.broadcast %1 : vector<1x16xi32> to vector<10x16xi32>
    %14 = arith.cmpi eq, %4, %13 : vector<10x16xi32>
    %15 = arith.extui %14 : vector<10x16xi1> to vector<10x16xi32>
    %16 = arith.sitofp %15 : vector<10x16xi32> to vector<10x16xf32>
    %c0_5 = arith.constant 0 : index
    %c0_6 = arith.constant 0 : index
    %17 = vector.load %arg4[%c0_5, %c0_6] : memref<32x50xf32, #tpu.memory_space<vmem>>, vector<32x50xf32>
    %cst = arith.constant dense<0.000000e+00> : vector<32x16xf32>
    %18 = tpu.matmul %17, %8, %cst {dimension_numbers = #tpu.dot_dimension_numbers<[1], [0], [0], [1], [0, 0, 1, 1], [], []>, precision = #tpu.contract_precision<fp32>} : vector<32x50xf32>, vector<50x16xf32>, vector<32x16xf32> -> vector<32x16xf32>
    %c0_7 = arith.constant 0 : index
    %c0_8 = arith.constant 0 : index
    %19 = vector.load %arg5[%c0_7, %c0_8] : memref<32x10xf32, #tpu.memory_space<vmem>>, vector<32x10xf32>
    %cst_9 = arith.constant dense<0.000000e+00> : vector<32x16xf32>
    %20 = tpu.matmul %19, %16, %cst_9 {dimension_numbers = #tpu.dot_dimension_numbers<[1], [0], [0], [1], [0, 0, 1, 1], [], []>, precision = #tpu.contract_precision<fp32>} : vector<32x10xf32>, vector<10x16xf32>, vector<32x16xf32> -> vector<32x16xf32>
    %c0_10 = arith.constant 0 : index
    %c0_11 = arith.constant 0 : index
    %21 = vector.load %arg6[%c0_10, %c0_11] : memref<32x50xf32, #tpu.memory_space<vmem>>, vector<32x50xf32>
    %cst_12 = arith.constant dense<0.000000e+00> : vector<32x16xf32>
    %22 = tpu.matmul %21, %12, %cst_12 {dimension_numbers = #tpu.dot_dimension_numbers<[1], [0], [0], [1], [0, 0, 1, 1], [], []>, precision = #tpu.contract_precision<fp32>} : vector<32x50xf32>, vector<50x16xf32>, vector<32x16xf32> -> vector<32x16xf32>
    %23 = arith.mulf %18, %18 : vector<32x16xf32>
    %cst_13 = arith.constant dense<0.000000e+00> : vector<16xf32>
    %24 = vector.multi_reduction <add>, %23, %cst_13 [0] : vector<32x16xf32> to vector<16xf32>
    %25 = vector.shape_cast %24 : vector<16xf32> to vector<1x16xf32>
    %26 = math.sqrt %25 : vector<1x16xf32>
    %27 = arith.mulf %20, %20 : vector<32x16xf32>
    %cst_14 = arith.constant dense<0.000000e+00> : vector<16xf32>
    %28 = vector.multi_reduction <add>, %27, %cst_14 [0] : vector<32x16xf32> to vector<16xf32>
    %29 = vector.shape_cast %28 : vector<16xf32> to vector<1x16xf32>
    %30 = math.sqrt %29 : vector<1x16xf32>
    %31 = arith.mulf %22, %22 : vector<32x16xf32>
    %cst_15 = arith.constant dense<0.000000e+00> : vector<16xf32>
    %32 = vector.multi_reduction <add>, %31, %cst_15 [0] : vector<32x16xf32> to vector<16xf32>
    %33 = vector.shape_cast %32 : vector<16xf32> to vector<1x16xf32>
    %34 = math.sqrt %33 : vector<1x16xf32>
    %35 = arith.addf %18, %20 : vector<32x16xf32>
    %36 = arith.mulf %22, %35 : vector<32x16xf32>
    %37 = arith.mulf %20, %18 : vector<32x16xf32>
    %38 = arith.subf %36, %37 : vector<32x16xf32>
    %cst_16 = arith.constant dense<0.000000e+00> : vector<16xf32>
    %39 = vector.multi_reduction <add>, %38, %cst_16 [0] : vector<32x16xf32> to vector<16xf32>
    %40 = vector.shape_cast %39 : vector<16xf32> to vector<1x16xf32>
    %41 = arith.addf %26, %30 : vector<1x16xf32>
    %42 = arith.addf %41, %34 : vector<1x16xf32>
    %cst_17 = arith.constant 2.000000e+00 : f32
    %43 = vector.broadcast %cst_17 : f32 to vector<1x16xf32>
    %44 = arith.mulf %43, %40 : vector<1x16xf32>
    %45 = arith.subf %42, %44 : vector<1x16xf32>
    %c0_18 = arith.constant 0 : index
    %c0_19 = arith.constant 0 : index
    %46 = vector.load %arg7[%c0_18, %c0_19] : memref<1x16xf32, #tpu.memory_space<vmem>>, vector<1x16xf32>
    tpu.vector_store %arg7[%c0_18, %c0_19], %45 {strides = array<i32>} : memref<1x16xf32, #tpu.memory_space<vmem>>, vector<1x16xf32>,
    return
  }
  func.func @transform_0(%arg0: i32) -> (i32, i32) {
    %c0_i32 = arith.constant 0 : i32
    %c0_i32_0 = arith.constant 0 : i32
    return %c0_i32, %arg0 : i32, i32
  }
  func.func @transform_1(%arg0: i32) -> (i32, i32) {
    %c0_i32 = arith.constant 0 : i32
    %c0_i32_0 = arith.constant 0 : i32
    return %c0_i32, %arg0 : i32, i32
  }
  func.func @transform_2(%arg0: i32) -> (i32, i32) {
    %c0_i32 = arith.constant 0 : i32
    %c0_i32_0 = arith.constant 0 : i32
    return %c0_i32, %arg0 : i32, i32
  }
  func.func @transform_3(%arg0: i32) -> (i32, i32) {
    %c0_i32 = arith.constant 0 : i32
    %c0_i32_0 = arith.constant 0 : i32
    %c0_i32_1 = arith.constant 0 : i32
    return %c0_i32, %c0_i32_0 : i32, i32
  }
  func.func @transform_4(%arg0: i32) -> (i32, i32) {
    %c0_i32 = arith.constant 0 : i32
    %c0_i32_0 = arith.constant 0 : i32
    %c0_i32_1 = arith.constant 0 : i32
    return %c0_i32, %c0_i32_0 : i32, i32
  }
  func.func @transform_5(%arg0: i32) -> (i32, i32) {
    %c0_i32 = arith.constant 0 : i32
    %c0_i32_0 = arith.constant 0 : i32
    %c0_i32_1 = arith.constant 0 : i32
    return %c0_i32, %c0_i32_0 : i32, i32
  }
  func.func @transform_6(%arg0: i32) -> (i32, i32) {
    %c0_i32 = arith.constant 0 : i32
    %c0_i32_0 = arith.constant 0 : i32
    return %c0_i32, %arg0 : i32, i32
  }
}

</mosaic_0001>

<bundles_post_ra>
// kernel: tpu_custom_call.1
= control target key start
LH: loop header
LB: loop body
LE: loop exit
PB: predicated region body
PF: predicated region fallthrough
CT: control target
= control target key end

     0   :  { %11 = vsyncpa [#allocation3], 0  ;;  %s3759_s0 = inlined_call_operand.vmem [shape: s32[1,16], index: 0, kind: input, shape index: {}]   ;;  %s3760_s1 = inlined_call_operand.vmem [shape: s32[1,16], index: 1, kind: input, shape index: {}]   ;;  %s3761_s2 = inlined_call_operand.hbm [shape: s32[1,16], index: 2, kind: input, shape index: {}]   ;;  %s3762_s3 = inlined_call_operand.vmem [shape: f32[32,50], index: 3, kind: input, shape index: {}]   ;;  %s3763_s4 = inlined_call_operand.vmem [shape: f32[32,10], index: 4, kind: input, shape index: {}]   ;;  %s3764_s5 = inlined_call_operand.vmem [shape: f32[32,50], index: 5, kind: input, shape index: {}]   ;;  %s3765_s6 = inlined_call_operand.hbm [shape: f32[1,16], index: 6, kind: output, shape index: {}]  }
   0x1   :  { %12 = vsyncpa [#allocation4], 0  ;;  %s3012_s21 = smov [#allocation2]   ;;  %s2964_s25 = scalar_lea.hbm %s3761_s2, 16 }
   0x2   :  { %s23_s22 = sshll.u32 %s3012_s21, 4  ;;  %p2965_p0 = scmp.ne.s32.totalorder %s3761_s2, %s2964_s25  ;;  %s24_s22 = int_to_ptr.vmem [resolvable:$true] %s23_s22 }
   0x3   :  { %p2968_p1 = scmp.lt.u32.totalorder %s2964_s25, %s3761_s2 }
   0x5   :  { %p2970_p2 = pnand %p2968_p1, %p2965_p0 }
   0x7   :  { %2973 = shalt.err (!%p2970_p2)
}
   0x8   :  { %s2974_s30 = scalar_lea.vmem %s24_s22, 16  ;;  %s2978_s7 = scalar_lea.vmem %s24_s22, 32 }
   0x9   :  { %p2975_p3 = scmp.ne.s32.totalorder %s24_s22, %s2974_s30  ;;  %p2979_p4 = scmp.lt.s32.totalorder %s24_s22, %s24_s22 }
   0xa   :  { %p2980_p5 = scmp.lt.s32.totalorder %s2978_s7, %s2974_s30 }
   0xc   :  { %p2981_p6 = por %p2980_p5, %p2979_p4 }
   0xe   :  { %p2982_p7 = pnand %p2981_p6, %p2975_p3 }
  0x10   :  { %2985 = shalt.err (!%p2982_p7)
}
  0x11   :  { %26 = dma.hbm_to_vmem [thread:$0]  %s3761_s2, 16, %s24_s22, [#allocation3]  }
  0x12   :  { %3008 = dma.done.wait [#allocation3], 16  }
  0x13   :  { %3009 = vsyncadd [#allocation3], 4294967280  ;;  %v39_v0 = vlaneseq  ;;  %v2184_v5 = vld [vmem:[%s3759_s0] ss:$0 sm:$0xff]  ;;  %vm124_vm0 = vcmask 1041408   ;;  %v3013_v9 = vmov 0.0  }
  0x14   :  { %v3091_v8 = vld [vmem:[%s3760_s1] ss:$0 sm:$0xff]  ;;  %vm111_vm6 = vcmask 408576   ;;  %v3014_v14 = vmov 1.0|1.0   ;;  %vm785_vm13 = vcmask 80896  }
  0x15   :  { %v3064_v1 = vshrl.u32 %v39_v0, 7  ;;  %v107_v24 = vld [vmem:[%s3762_s3] sm:$0xff]  ;;  %v108_v32 = vld [vmem:[%s3762_s3 + $0x8] sm:$0xff]  ;;  %v3015_v50 = vmov 1.0   ;;  %v783_v59 = vld [vmem:[%s3763_s4 + $0x10] sm:$0xff] }
  0x16   :  { %v781_v31 = vld [vmem:[%s3763_s4] sm:$0xff]  ;;  %v113_v35 = vsel %vm111_vm6, %v107_v24, 0  ;;  %v116_v44 = vsel %vm111_vm6, %v108_v32, 0  ;;  %v782_v49 = vld [vmem:[%s3763_s4 + $0x8] sm:$0xff]  ;;  %v784_v60 = vld [vmem:[%s3763_s4 + $0x18] sm:$0xff] }
  0x17   :  { %v3067_v2 = vadd.s32 8, %v3064_v1  ;;  %v3070_v3 = vadd.s32 16, %v3064_v1  ;;  %v3073_v4 = vadd.s32 24, %v3064_v1  ;;  %v3079_v6 = vadd.s32 32, %v3064_v1  ;;  %v110_v24 = vld [vmem:[%s3762_s3 + $0x18] sm:$0xff] }
  0x18   :  { %v3082_v7 = vadd.s32 40, %v3064_v1  ;;  %vm51_vm1 = vcmp.eq.s32.totalorder %v3064_v1, %v2184_v5  ;;  %v3100_v13 = vadd.s32 48, %v3064_v1  ;;  %vm101_vm10 = vcmp.eq.s32.totalorder %v3064_v1, %v3091_v8 }
  0x19   :  { %vm52_vm2 = vcmp.eq.s32.totalorder %v3067_v2, %v2184_v5  ;;  %vm53_vm3 = vcmp.eq.s32.totalorder %v3070_v3, %v2184_v5  ;;  %vm54_vm4 = vcmp.eq.s32.totalorder %v3073_v4, %v2184_v5  ;;  %v2185_v10 = vsel %vm51_vm1, 1.0, %v3013_v9  ;;  %vm3277_vm15 = vmpackc.low %vm124_vm0, %vm101_vm10 }
  0x1a   :  { %v2186_v11 = vsel %vm52_vm2, 1.0, %v3013_v9  ;;  %vm3095_vm5 = vmpackc.low %vm52_vm2, %vm51_vm1  ;;  %v3105_v15 = vsub.f32 %v2185_v10, %v2185_v10  ;;  %v2187_v17 = vsel %vm53_vm3, 1.0, %v3013_v9  ;;  %v2188_v18 = vsel %vm54_vm4, 1.0, %v3013_v9 }
  0x1b   :  { %2720 = vmatprep.subr.msk.bf16.mxu0 %vm3095_vm5, %v3014_v14  ;;  %v3107_v16 = vsub.f32 %v2186_v11, %v2186_v11  ;;  %vm3115_vm7 = vmpackc.low %vm54_vm4, %vm53_vm3  ;;  %vm55_vm8 = vcmp.eq.s32.totalorder %v3079_v6, %v2184_v5  ;;  %vm56_vm9 = vcmp.eq.s32.totalorder %v3082_v7, %v2184_v5  ;;  %vm102_vm11 = vcmp.eq.s32.totalorder %v3067_v2, %v3091_v8 }
  0x1c   :  { %2722 = vmatpush3.bf16.msk.msra.mxu0 %vm3095_vm5, %v3014_v14  ;;  %v2189_v20 = vsel %vm55_vm8, 1.0, %v3013_v9  ;;  %v2190_v21 = vsel %vm56_vm9, 1.0, %v3013_v9  ;;  %v2201_v22 = vsel %vm101_vm10, 1.0, %v3013_v9  ;;  %v2202_v23 = vsel %vm102_vm11, 1.0, %v3013_v9  ;;  %vm3143_vm12 = vmpackc.low %vm56_vm9, %vm55_vm8 }
  0x1d   :  { %2724 = vmatprep.subr.msk.bf16.mxu0 %vm3115_vm7, %v3014_v14  ;;  %v3141_v25 = vsub.f32 %v2187_v17, %v2187_v17  ;;  %v799_v27 = vsel %vm124_vm0, %v2202_v23, 0  ;;  %v3148_v28 = vsub.f32 %v2188_v18, %v2188_v18  ;;  %v3150_v29 = vsub.f32 %v2201_v22, %v2201_v22 }
  0x1e   :  { %v3152_v30 = vsub.f32 %v799_v27, %v799_v27  ;;  %vm57_vm14 = vcmp.eq.s32.totalorder %v3100_v13, %v2184_v5  ;;  %v3164_v33 = vsub.f32 %v2189_v20, %v2189_v20  ;;  %v3166_v34 = vsub.f32 %v2190_v21, %v2190_v21 }
  0x1f   :  { %v243_v36 = vand.u32 4294901760, %v3105_v15  ;;  %v911_v37 = vand.u32 4294901760, %v3150_v29  ;;  %v3175_v39 = vand.u32 4294901760, %v113_v35  ;;  %v250_v40 = vand.u32 4294901760, %v3107_v16 }
  0x20   :  { %2726 = vmatpush3.bf16.msk.msra.mxu0 %vm3115_vm7, %v3014_v14  ;;  %v918_v38 = vand.u32 4294901760, %v3152_v30  ;;  %v3179_v41 = vsel %vm57_vm14, 1.0, %v3013_v9  ;;  %v787_v43 = vsel %vm785_vm13, %v781_v31, 0  ;;  %v3204_v51 = vpack.c.bf16 %v2202_v23, %v3015_v50  ;;  %v109_v23 = vld [vmem:[%s3762_s3 + $0x10] sm:$0xff] }
  0x21   :  { %2728 = vmatprep.subr.msk.bf16.mxu0 %vm3143_vm12, %v3014_v14  ;;  %v244_v42 = vsub.f32 %v3105_v15, %v243_v36  ;;  %v912_v45 = vsub.f32 %v3150_v29, %v911_v37  ;;  %v3193_v47 = vsub.f32 %v113_v35, %v3175_v39  ;;  %v251_v48 = vsub.f32 %v3107_v16, %v250_v40 }
  0x22   :  { %v919_v46 = vsub.f32 %v3152_v30, %v918_v38  ;;  %v3206_v53 = vand.u32 4294901760, %v787_v43  ;;  %v3208_v54 = vand.u32 4294901760, %v116_v44  ;;  %v790_v62 = vsel %vm785_vm13, %v782_v49, 0 }
  0x23   :  { %v245_v52 = vand.u32 4294901760, %v244_v42  ;;  %v913_v55 = vand.u32 4294901760, %v912_v45  ;;  %v202_v57 = vand.u32 4294901760, %v3193_v47  ;;  %v252_v58 = vand.u32 4294901760, %v251_v48 }
  0x24   :  { %2730 = vmatpush3.bf16.msk.msra.mxu0 %vm3143_vm12, %v3014_v14  ;;  %v920_v56 = vand.u32 4294901760, %v919_v46  ;;  %2553 = vmatprep.mubr.f32.mxu1 %v3206_v53  ;;  %v3221_v61 = vsub.f32 %v116_v44, %v3208_v54  ;;  %v2801_v63 = vpack.c.bf16 %v3152_v30, %v3150_v29  ;;  %v257_v0 = vand.u32 4294901760, %v3141_v25 }
  0x25   :  { %2431 = vmatprep.subr.msk.mxu0 %vm124_vm0, %v3179_v41  ;;  %v203_v10 = vsub.f32 %v3193_v47, %v202_v57  ;;  %v2731_v11 = vpack.c.bf16 %v252_v58, %v245_v52  ;;  %v264_v17 = vand.u32 4294901760, %v3148_v28  ;;  %v793_v21 = vsel %vm785_vm13, %v783_v59, 0 }
  0x26   :  { %v2797_v5 = vpack.c.bf16 %v920_v56, %v913_v55  ;;  %v212_v18 = vand.u32 4294901760, %v3221_v61  ;;  %v258_v20 = vsub.f32 %v3141_v25, %v257_v0  ;;  %v796_v22 = vsel %vm785_vm13, %v784_v60, 0 }
  0x27   :  { %v204_v27 = vand.u32 4294901760, %v203_v10  ;;  %v3245_v31 = vand.u32 4294901760, %v790_v62  ;;  %v265_v32 = vsub.f32 %v3148_v28, %v264_v17  ;;  %v3250_v35 = vand.u32 4294901760, %v793_v21 }
  0x28   :  { %2432 = vmatpush3.msk.msra.mxu0 %vm124_vm0, %v3179_v41  ;;  %2798 = vmatprep.subr.bf16.mxu1 %v2797_v5  ;;  %v213_v42 = vsub.f32 %v3221_v61, %v212_v18  ;;  %v259_v44 = vand.u32 4294901760, %v258_v20  ;;  %v3771_v45 = vand.u32 4294901760, %v3164_v33  ;;  %v3767_v46 = vand.u32 4294901760, %v3166_v34 }
  0x29   :  { %2732 = vmatprep.subr.bf16.mxu0 %v2731_v11  ;;  %2800 = vmatpush3.bf16.msra.mxu1 %v2797_v5  ;;  %v266_v48 = vand.u32 4294901760, %v265_v32  ;;  %v3257_v49 = vand.u32 4294901760, %v796_v22  ;;  %v119_v50 = vsel %vm111_vm6, %v109_v23, 0  ;;  %v122_v52 = vsel %vm111_vm6, %v110_v24, 0 }
  0x2a   :  { %2433 = vmatprep.mubr.f32.mxu0 %v204_v27  ;;  %2802 = vmatprep.subr.bf16.mxu1 %v2801_v63  ;;  %v214_v55 = vand.u32 4294901760, %v213_v42  ;;  %v272_v56 = vsub.f32 %v3164_v33, %v3771_v45  ;;  %v279_v58 = vsub.f32 %v3166_v34, %v3767_v46  ;;  %v3267_v59 = vand.u32 4294901760, %v119_v50  ;;  %v3294_v42 = vld [vmem:[#allocation2] ss:$0 sm:$0xff] }
  0x2b   :  { %v2735_v60 = vpack.c.bf16 %v266_v48, %v259_v44  ;;  %v3271_v5 = vsub.f32 %v787_v43, %v3206_v53  ;;  %v3281_v20 = vand.u32 4294901760, %v122_v52  ;;  %v126_v23 = vsel %vm124_vm0, %v3179_v41, 0 }
  0x2c   :  { %2554 = vmatmul.mubr.f32.vlgmr.msra.gmra.mrb[0].mxu1 %v3245_v31  ;;  %2434 = vmatmul.mubr.f32.vlgmr.msra.gmra.mrb[0].mxu0 %v214_v55  ;;  %v273_v24 = vand.u32 4294901760, %v272_v56  ;;  %v280_v27 = vand.u32 4294901760, %v279_v58  ;;  %v3286_v43 = vsub.f32 %v119_v50, %v3267_v59  ;;  %v3288_v32 = vsub.f32 %v126_v23, %v126_v23 }
  0x2d   :  { %2804 = vmatpush3.bf16.msra.mxu1 %v2801_v63  ;;  %2734 = vmatpush3.bf16.msra.mxu0 %v2731_v11  ;;  %v3292_v8 = vsub.f32 %v122_v52, %v3281_v20  ;;  %v3304_v11 = vsub.f32 %v790_v62, %v3245_v31  ;;  %v3315_v56 = vsub.f32 %v793_v21, %v3250_v35 }
  0x2e   :  { %2556 = vmatprep.mubr.f32.mxu1 %v3250_v35  ;;  %2736 = vmatprep.subr.bf16.mxu0 %v2735_v60  ;;  %v2739_v44 = vpack.c.bf16 %v280_v27, %v273_v24  ;;  %v3773_v63 = vand.u32 4294901760, %v3286_v43  ;;  %v3301_v48 = vand.u32 4294901760, %v3288_v32  ;;  %v3318_v58 = vsub.f32 %v796_v22, %v3257_v49 }
  0x2f   :  { %2807 = vmatprep.subr.msk.bf16.mxu1 %vm3277_vm15, %v3204_v51  ;;  %v3766_v50 = vand.u32 4294901760, %v3292_v8  ;;  %vm76_vm1 = vcmp.eq.s32.totalorder %v3064_v1, %v3294_v42  ;;  %vm77_vm2 = vcmp.eq.s32.totalorder %v3067_v2, %v3294_v42  ;;  %vm78_vm3 = vcmp.eq.s32.totalorder %v3070_v3, %v3294_v42 }
  0x30   :  { %2557 = vmatmul.mubr.f32.gmra.mrb[2].mxu1 %v3257_v49  ;;  %v223_v52 = vsub.f32 %v3286_v43, %v3773_v63  ;;  %v286_v55 = vsub.f32 %v3288_v32, %v3301_v48  ;;  %v2193_v22 = vsel %vm76_vm1, 1.0, %v3013_v9  ;;  %vm79_vm4 = vcmp.eq.s32.totalorder %v3073_v4, %v3294_v42 }
  0x31   :  { %2563 = vmatprep.mubr.f32.mxu1 %v3271_v5  ;;  %2738 = vmatpush3.bf16.msra.mxu0 %v2735_v60  ;;  %v233_v62 = vsub.f32 %v3292_v8, %v3766_v50  ;;  %v2194_v60 = vsel %vm77_vm2, 1.0, %v3013_v9  ;;  %v3338_v27 = vsub.f32 %v2193_v22, %v2193_v22  ;;  %v2196_v29 = vsel %vm79_vm4, 1.0, %v3013_v9  ;;  %vm3576_vm11 = vmpackc.low %vm79_vm4, %vm78_vm3 }
  0x32   :  { %2740 = vmatprep.subr.bf16.mxu0 %v2739_v44  ;;  %v224_v21 = vand.u32 4294901760, %v223_v52  ;;  %v287_v23 = vand.u32 4294901760, %v286_v55  ;;  %v3340_v50 = vsub.f32 %v2194_v60, %v2194_v60  ;;  %v3768_v52 = vand.u32 4294901760, %v3271_v5 }
  0x33   :  { %v234_v24 = vand.u32 4294901760, %v233_v62  ;;  %v2811_v55 = vpack.c.bf16 %v918_v38, %v911_v37  ;;  %v3770_v62 = vand.u32 4294901760, %v3338_v27  ;;  %v2743_v30 = vpack.c.bf16 %v3107_v16, %v3105_v15 }
  0x34   :  { %2564 = vmatmul.mubr.f32.vlgmr.msra.gmra.mrb[0].mxu1 %v3304_v11  ;;  %2436 = vmatprep.mubr.f32.mxu0 %v224_v21  ;;  %v3769_v22 = vand.u32 4294901760, %v3340_v50  ;;  %v2195_v21 = vsel %vm78_vm3, 1.0, %v3013_v9  ;;  %v3772_v37 = vand.u32 4294901760, %v3304_v11  ;;  %vm80_vm8 = vcmp.eq.s32.totalorder %v3079_v6, %v3294_v42 }
  0x35   :  { %2810 = vmatpush3.bf16.msk.msra.mxu1 %vm3277_vm15, %v3204_v51  ;;  %2742 = vmatpush3.bf16.msra.mxu0 %v2739_v44  ;;  %vm81_vm9 = vcmp.eq.s32.totalorder %v3082_v7, %v3294_v42  ;;  %v2747_v38 = vpack.c.bf16 %v3148_v28, %v3141_v25  ;;  %v3376_v44 = vsub.f32 %v2195_v21, %v2195_v21  ;;  %v2197_v21 = vsel %vm80_vm8, 1.0, %v3013_v9  ;;  %v1392_v25 = vld [vmem:[%s3764_s5 + $0x18] sm:$0xff] }
  0x36   :  { %2566 = vmatprep.mubr.f32.mxu1 %v3315_v56  ;;  %2437 = vmatmul.mubr.f32.gmra.mrb[2].mxu0 %v234_v24  ;;  %v3378_v60 = vsub.f32 %v2196_v29, %v2196_v29  ;;  %vm82_vm10 = vcmp.eq.s32.totalorder %v3100_v13, %v3294_v42  ;;  %v3775_v24 = vand.u32 4294901760, %v3315_v56  ;;  %v1524_v46 = vsub.f32 %v3338_v27, %v3770_v62 }
  0x37   :  { %2451 = vmatprep.subr.mxu0 %v287_v23  ;;  %2453 = vmatprep.mubr.f32.mxu0 %v3175_v39  ;;  %v2198_v13 = vsel %vm81_vm9, 1.0, %v3013_v9  ;;  %v3402_v29 = vsel %vm82_vm10, 1.0, %v3013_v9  ;;  %v1537_v62 = vand.u32 4294901760, %v3376_v44  ;;  %v3411_v63 = vsub.f32 %v2197_v21, %v2197_v21 }
  0x38   :  { %2567 = vmatmul.mubr.f32.gmra.mrb[2].mxu1 %v3318_v58  ;;  %2812 = vmatprep.subr.bf16.mxu1 %v2811_v55  ;;  %v3776_v45 = vand.u32 4294901760, %v3378_v60  ;;  %v3413_v9 = vsub.f32 %v2198_v13, %v2198_v13  ;;  %v2845_v15 = vpack.c.bf16 %v3340_v50, %v3338_v27  ;;  %v2849_v28 = vpack.c.bf16 %v3378_v60, %v3376_v44 }
  0x39   :  { %2573 = vmatprep.mubr.f32.mxu1 %v3768_v52  ;;  %2452 = vmatpush3.msra.mxu0 %v287_v23  ;;  %v1531_v52 = vsub.f32 %v3340_v50, %v3769_v22  ;;  %v3774_v23 = vand.u32 4294901760, %v3318_v58  ;;  %v2751_v22 = vpack.c.bf16 %v3166_v34, %v3164_v33  ;;  %v1551_v21 = vand.u32 4294901760, %v3411_v63 }
  0x3a   :  { %2744 = vmatprep.subr.bf16.mxu0 %v2743_v30  ;;  %2454 = vmatmul.mubr.f32.vlgmr.msra.gmra.mrb[0].mxu0 %v3208_v54  ;;  %v3777_v13 = vand.u32 4294901760, %v3413_v9  ;;  %v3796_v6 = vand.u32 4294901760, %v3271_v5  ;;  %v3797_v19 = vand.u32 4294901760, %v3338_v27  ;;  %v3798_v26 = vand.u32 4294901760, %v3340_v50 }
  0x3b   :  { %2746 = vmatpush3.bf16.msra.mxu0 %v2743_v30  ;;  %2456 = vmatprep.mubr.f32.mxu0 %v3267_v59  ;;  %v1525_v30 = vand.u32 4294901760, %v1524_v46  ;;  %v1538_v46 = vsub.f32 %v3376_v44, %v1537_v62  ;;  %v3800_v50 = vand.u32 4294901760, %v3378_v60  ;;  %v3801_v27 = vand.u32 4294901760, %v3315_v56 }
  0x3c   :  { %2574 = vmatmul.mubr.f32.vlgmr.msra.gmra.mrb[0].mxu1 %v3772_v37  ;;  %2748 = vmatprep.subr.bf16.mxu0 %v2747_v38  ;;  %v1532_v37 = vand.u32 4294901760, %v1531_v52  ;;  %v1406_v52 = vsel %vm124_vm0, %v3402_v29, 0  ;;  %v871_v7 = vsub.f32 %v3271_v5, %v3796_v6  ;;  %v3799_v5 = vand.u32 4294901760, %v3304_v11 }
  0x3d   :  { %2814 = vmatpush3.bf16.msra.mxu1 %v2811_v55  ;;  %2576 = vmatprep.mubr.f32.mxu1 %v3775_v24  ;;  %v1552_v24 = vsub.f32 %v3411_v63, %v1551_v21  ;;  %v3802_v10 = vand.u32 4294901760, %v3318_v58  ;;  %v3803_v44 = vand.u32 4294901760, %v3413_v9 }
  0x3e   :  { %2457 = vmatmul.mubr.f32.gmra.mrb[2].mxu0 %v3281_v20  ;;  %2817 = vmatprep.subr.msk.bf16.mxu1 %vm3277_vm15, %v3204_v51  ;;  %v2833_v55 = vpack.c.bf16 %v1532_v37, %v1525_v30  ;;  %v1539_v37 = vand.u32 4294901760, %v1538_v46 }
  0x3f   :  { %2750 = vmatpush3.bf16.msra.mxu0 %v2747_v38  ;;  %2473 = vmatprep.mubr.f32.mxu0 %v3193_v47  ;;  %v1545_v38 = vsub.f32 %v3378_v60, %v3776_v45  ;;  %v1389_v45 = vld [vmem:[%s3764_s5] sm:$0xff]  ;;  %v2767_v47 = vpack.c.bf16 %v250_v40, %v243_v36  ;;  %v3786_v40 = vand.u32 4294901760, %v3286_v43  ;;  %v2877_v60 = vpack.c.bf16 %v3803_v44, %v1551_v21 }
  0x40   :  { %2577 = vmatmul.mubr.f32.gmra.mrb[2].mxu1 %v3774_v23  ;;  %2752 = vmatprep.subr.bf16.mxu0 %v2751_v22  ;;  %v3438_v23 = vsub.f32 %v1406_v52, %v1406_v52  ;;  %v1394_v46 = vsel %vm111_vm6, %v1389_v45, 0 }
  0x41   :  { %2583 = vmatprep.mubr.f32.mxu1 %v3206_v53  ;;  %v1546_v30 = vand.u32 4294901760, %v1545_v38  ;;  %v1553_v38 = vand.u32 4294901760, %v1552_v24  ;;  %v3470_v45 = vand.u32 4294901760, %v1394_v46 }
  0x43   :  { %2754 = vmatpush3.bf16.msra.mxu0 %v2751_v22  ;;  %v1559_v22 = vsub.f32 %v3413_v9, %v3777_v13  ;;  %v2837_v52 = vpack.c.bf16 %v1546_v30, %v1539_v37  ;;  %v3789_v37 = vand.u32 4294901760, %v3292_v8 }
  0x44   :  { %2584 = vmatmul.mubr.f32.vlgmr.msra.gmra.mrb[0].mxu1 %v3245_v31  ;;  %2471 = vmatprep.subr.mxu0 %v3288_v32 }
  0x45   :  { %2820 = vmatpush3.bf16.msk.msra.mxu1 %vm3277_vm15, %v3204_v51  ;;  %2586 = vmatprep.mubr.f32.mxu1 %v3250_v35  ;;  %v1560_v13 = vand.u32 4294901760, %v1559_v22 }
  0x46   :  { %2834 = vmatprep.subr.bf16.mxu1 %v2833_v55 }
  0x47   :  { %2472 = vmatpush3.msra.mxu0 %v3288_v32  ;;  %v3462_v32 = vand.u32 4294901760, %v3438_v23 }
  0x48   :  { %2587 = vmatmul.mubr.f32.gmra.mrb[2].mxu1 %v3257_v49  ;;  %2756 = vmatprep.subr.msk.bf16.mxu0 %vm3095_vm5, %v3014_v14 }
  0x49   :  { %2474 = vmatmul.mubr.f32.vlgmr.msra.gmra.mrb[0].mxu0 %v3221_v61  ;;  %2593 = vmatprep.mubr.f32.mxu1 %v3206_v53  ;;  %v2841_v53 = vpack.c.bf16 %v1560_v13, %v1553_v38  ;;  %v1566_v24 = vsub.f32 %v3438_v23, %v3462_v32  ;;  %v3788_v61 = vand.u32 4294901760, %v3166_v34  ;;  %v1403_v13 = vsel %vm111_vm6, %v1392_v25, 0 }
  0x4a   :  { %2758 = vmatpush3.bf16.msk.msra.mxu0 %vm3095_vm5, %v3014_v14  ;;  %2476 = vmatprep.mubr.f32.mxu0 %v3286_v43  ;;  %v2853_v43 = vpack.c.bf16 %v3413_v9, %v3411_v63  ;;  %v3538_v34 = vsub.f32 %v1394_v46, %v3470_v45 }
  0x4b   :  { %2760 = vmatprep.subr.msk.bf16.mxu0 %vm3115_vm7, %v3014_v14 }
  0x4c   :  { %2594 = vmatmul.mubr.f32.vlgmr.msra.gmra.mrb[0].mxu1 %v3245_v31  ;;  %v1390_v31 = vld [vmem:[%s3764_s5 + $0x8] sm:$0xff]  ;;  %v1482_v12 = vand.u32 4294901760, %v3538_v34 }
  0x4d   :  { %2836 = vmatpush3.bf16.msra.mxu1 %v2833_v55  ;;  %2596 = vmatprep.mubr.f32.mxu1 %v3250_v35  ;;  %v1567_v35 = vand.u32 4294901760, %v1566_v24  ;;  %v2771_v55 = vpack.c.bf16 %v264_v17, %v257_v0  ;;  %v3787_v0 = vand.u32 4294901760, %v3164_v33  ;;  %v3534_v33 = vand.u32 4294901760, %v1403_v13 }
  0x4e   :  { %2762 = vmatpush3.bf16.msk.msra.mxu0 %vm3115_vm7, %v3014_v14  ;;  %2838 = vmatprep.subr.bf16.mxu1 %v2837_v52  ;;  %v1483_v22 = vsub.f32 %v3538_v34, %v1482_v12 }
  0x4f   :  { %2764 = vmatprep.subr.msk.bf16.mxu0 %vm3143_vm12, %v3014_v14  ;;  %2477 = vmatmul.mubr.f32.gmra.mrb[2].mxu0 %v3292_v8  ;;  %v2775_v17 = vpack.c.bf16 %v3788_v61, %v3787_v0  ;;  %v3612_v4 = vsub.f32 %v1403_v13, %v3534_v33 }
  0x50   :  { %2597 = vmatmul.mubr.f32.gmra.mrb[2].mxu1 %v3257_v49  ;;  %2493 = vmatprep.mubr.f32.mxu0 %v202_v57  ;;  %v1397_v57 = vsel %vm111_vm6, %v1390_v31, 0  ;;  %v1391_v49 = vld [vmem:[%s3764_s5 + $0x10] sm:$0xff]  ;;  %v1484_v46 = vand.u32 4294901760, %v1483_v22  ;;  %s3016_s5 = smov [#allocation5]  }
  0x51   :  { %2840 = vmatpush3.bf16.msra.mxu1 %v2837_v52  ;;  %2633 = vmatprep.mubr.f32.mxu1 %v3470_v45  ;;  %v3509_v16 = vand.u32 4294901760, %v1397_v57  ;;  %v1400_v36 = vsel %vm111_vm6, %v1391_v49, 0  ;;  %vm3558_vm6 = vmpackc.low %vm77_vm2, %vm76_vm1  ;;  %s2175_s9 = sshll.u32 %s3016_s5, 4  ;;  %vm2167_vm2 = vcmask 122880   ;;  %s2176_s9 = int_to_ptr.vmem [resolvable:$true] %s2175_s9 }
  0x52   :  { %2766 = vmatpush3.bf16.msk.msra.mxu0 %vm3143_vm12, %v3014_v14  ;;  %2842 = vmatprep.subr.bf16.mxu1 %v2841_v53  ;;  %s2986_s10 = scalar_lea.vmem %s2176_s9, 16  ;;  %s2990_s11 = scalar_lea.vmem %s2176_s9, 32 }
  0x53   :  { %2491 = vmatprep.subr.msk.mxu0 %vm124_vm0, %v3179_v41  ;;  %v3546_v8 = vsub.f32 %v1397_v57, %v3509_v16  ;;  %p2987_p8 = scmp.ne.s32.totalorder %s2176_s9, %s2986_s10  ;;  %p2991_p9 = scmp.lt.s32.totalorder %s2176_s9, %s2176_s9 }
  0x54   :  { %p2992_p10 = scmp.lt.s32.totalorder %s2990_s11, %s2986_s10 }
  0x55   :  { %2844 = vmatpush3.bf16.msra.mxu1 %v2841_v53  ;;  %v1492_v42 = vand.u32 4294901760, %v3546_v8 }
  0x56   :  { %2492 = vmatpush3.msk.msra.mxu0 %vm124_vm0, %v3179_v41  ;;  %2631 = vmatprep.subr.mxu1 %v1567_v35  ;;  %p2993_p11 = por %p2992_p10, %p2991_p9 }
  0x57   :  { %2768 = vmatprep.subr.bf16.mxu0 %v2767_v47  ;;  %2494 = vmatmul.mubr.f32.vlgmr.msra.gmra.mrb[0].mxu0 %v212_v18  ;;  %v3526_v18 = vand.u32 4294901760, %v1400_v36  ;;  %v1493_v63 = vsub.f32 %v3546_v8, %v1492_v42 }
  0x58   :  { %2770 = vmatpush3.bf16.msra.mxu0 %v2767_v47  ;;  %2496 = vmatprep.mubr.f32.mxu0 %v3786_v40  ;;  %p2994_p12 = pnand %p2993_p11, %p2987_p8 }
  0x59   :  { %2632 = vmatpush3.msra.mxu1 %v1567_v35  ;;  %2772 = vmatprep.subr.bf16.mxu0 %v2771_v55  ;;  %v3585_v2 = vsub.f32 %v1400_v36, %v3526_v18  ;;  %v1494_v9 = vand.u32 4294901760, %v1493_v63 }
  0x5a   :  { %2846 = vmatprep.subr.bf16.mxu1 %v2845_v15  ;;  %2634 = vmatmul.mubr.f32.vlgmr.msra.gmra.mrb[4].mxu1 %v3509_v16 }
  0x5b   :  { %2848 = vmatpush3.bf16.msra.mxu1 %v2845_v15  ;;  %2497 = vmatmul.mubr.f32.gmra.mrb[2].mxu0 %v3789_v37 }
  0x5c   :  { %2774 = vmatpush3.bf16.msra.mxu0 %v2771_v55  ;;  %2850 = vmatprep.subr.bf16.mxu1 %v2849_v28 }
  0x5d   :  { %2776 = vmatprep.subr.bf16.mxu0 %v2775_v17  ;;  %2513 = vmatprep.mubr.f32.mxu0 %v3175_v39 }
  0x5e   :  { %2636 = vmatprep.mubr.f32.mxu1 %v3526_v18 }
  0x5f   :  { %2852 = vmatpush3.bf16.msra.mxu1 %v2849_v28 }
  0x60   :  { %2778 = vmatpush3.bf16.msra.mxu0 %v2775_v17  ;;  %2854 = vmatprep.subr.bf16.mxu1 %v2853_v43 }
  0x61   :  { %2511 = vmatprep.subr.mxu0 %v3301_v48  ;;  %2637 = vmatmul.mubr.f32.gmra.mrb[6].mxu1 %v3534_v33 }
  0x62   :  { %2653 = vmatprep.mubr.f32.mxu1 %v3538_v34 }
  0x63   :  { %2856 = vmatpush3.bf16.msra.mxu1 %v2853_v43 }
  0x64   :  { %2512 = vmatpush3.msra.mxu0 %v3301_v48  ;;  %2651 = vmatprep.subr.mxu1 %v3438_v23  ;;  %v872_v48 = vand.u32 4294901760, %v871_v7 }
  0x65   :  { %2780 = vmatprep.subr.msk.bf16.mxu0 %vm3095_vm5, %v3014_v14  ;;  %2514 = vmatmul.mubr.f32.vlgmr.msra.gmra.mrb[0].mxu0 %v3208_v54 }
  0x66   :  { %2782 = vmatpush3.bf16.msk.msra.mxu0 %vm3095_vm5, %v3014_v14  ;;  %2516 = vmatprep.mubr.f32.mxu0 %v3267_v59  ;;  %vm3606_vm5 = vmpackc.low %vm81_vm9, %vm80_vm8 }
  0x67   :  { %2652 = vmatpush3.msra.mxu1 %v3438_v23  ;;  %2784 = vmatprep.subr.msk.bf16.mxu0 %vm3115_vm7, %v3014_v14  ;;  %v891_v23 = vsub.f32 %v3315_v56, %v3801_v27  ;;  %v901_v56 = vsub.f32 %v3318_v58, %v3802_v10 }
  0x68   :  { %2858 = vmatprep.subr.msk.bf16.mxu1 %vm3558_vm6, %v3014_v14  ;;  %2654 = vmatmul.mubr.f32.vlgmr.msra.gmra.mrb[4].mxu1 %v3546_v8 }
  0x69   :  { %2860 = vmatpush3.bf16.msk.msra.mxu1 %vm3558_vm6, %v3014_v14  ;;  %2517 = vmatmul.mubr.f32.gmra.mrb[2].mxu0 %v3281_v20 }
  0x6a   :  { %2786 = vmatpush3.bf16.msk.msra.mxu0 %vm3115_vm7, %v3014_v14  ;;  %2862 = vmatprep.subr.msk.bf16.mxu1 %vm3576_vm11, %v3014_v14  ;;  %vm2065_vm7 = vcmask 130048  }
  0x6b   :  { %2788 = vmatprep.subr.msk.bf16.mxu0 %vm3143_vm12, %v3014_v14  ;;  %2533 = vmatprep.mubr.f32.mxu0 %v3175_v39  ;;  %v2869_v39 = vpack.c.bf16 %v3798_v26, %v3797_v19 }
  0x6c   :  { %2656 = vmatprep.mubr.f32.mxu1 %v3585_v2 }
  0x6d   :  { %2864 = vmatpush3.bf16.msk.msra.mxu1 %vm3576_vm11, %v3014_v14 }
  0x6e   :  { %2790 = vmatpush3.bf16.msk.msra.mxu0 %vm3143_vm12, %v3014_v14  ;;  %2866 = vmatprep.subr.msk.bf16.mxu1 %vm3606_vm5, %v3014_v14 }
  0x6f   :  { %2531 = vmatprep.subr.msk.mxu0 %vm124_vm0, %v3179_v41  ;;  %2657 = vmatmul.mubr.f32.gmra.mrb[6].mxu1 %v3612_v4 }
  0x70   :  { %2673 = vmatprep.mubr.f32.mxu1 %v1482_v12 }
  0x71   :  { %2868 = vmatpush3.bf16.msk.msra.mxu1 %vm3606_vm5, %v3014_v14 }
  0x72   :  { %2532 = vmatpush3.msk.msra.mxu0 %vm124_vm0, %v3179_v41  ;;  %2671 = vmatprep.subr.msk.mxu1 %vm124_vm0, %v3402_v29  ;;  %v881_v41 = vsub.f32 %v3304_v11, %v3799_v5  ;;  %v1502_v11 = vand.u32 4294901760, %v3585_v2 }
  0x73   :  { %2534 = vmatmul.mubr.f32.vlgmr.msra.gmra.mrb[0].mxu0 %v3208_v54  ;;  %2793 = vmatprep.subr.msk.bf16.mxu0 %vm3277_vm15, %v3204_v51  ;;  %v2873_v54 = vpack.c.bf16 %v3800_v50, %v1537_v62  ;;  %v892_v62 = vand.u32 4294901760, %v891_v23 }
  0x74   :  { %2536 = vmatprep.mubr.f32.mxu0 %v3267_v59  ;;  %2796 = vmatpush3.bf16.msk.msra.mxu0 %vm3277_vm15, %v3204_v51  ;;  %v1512_v51 = vand.u32 4294901760, %v3612_v4  ;;  %v882_v59 = vand.u32 4294901760, %v881_v41  ;;  %v1503_v58 = vsub.f32 %v3585_v2, %v1502_v11 }
  0x75   :  { %2672 = vmatpush3.msk.msra.mxu1 %vm124_vm0, %v3402_v29  ;;  %2822 = vmatprep.subr.msk.bf16.mxu0 %vm3558_vm6, %v3014_v14 }
  0x76   :  { %2870 = vmatprep.subr.bf16.mxu1 %v2869_v39  ;;  %2674 = vmatmul.mubr.f32.vlgmr.msra.gmra.mrb[4].mxu1 %v1492_v42  ;;  %v1513_v21 = vsub.f32 %v3612_v4, %v1512_v51  ;;  %v1504_v52 = vand.u32 4294901760, %v1503_v58 }
  0x77   :  { %2537 = vmatmul.mubr.f32.gmra.mrb[2].mxu0 %v3281_v20  ;;  %2872 = vmatpush3.bf16.msra.mxu1 %v2869_v39  ;;  %v902_v20 = vand.u32 4294901760, %v901_v56 }
  0x78   :  { %2543 = vmatprep.mubr.f32.mxu0 %v872_v48  ;;  %2874 = vmatprep.subr.bf16.mxu1 %v2873_v54  ;;  %v1514_v38 = vand.u32 4294901760, %v1513_v21 }
  0x79   :  { %2676 = vmatprep.mubr.f32.mxu1 %v1502_v11 }
  0x7a   :  { %2677 = vmatmul.mubr.f32.gmra.mrb[6].mxu1 %v1512_v51 }
  0x7b   :  { %2544 = vmatmul.mubr.f32.vlgmr.msra.gmra.mrb[4].mxu0 %v882_v59  ;;  %2876 = vmatpush3.bf16.msra.mxu1 %v2873_v54 }
  0x7c   :  { %2546 = vmatprep.mubr.f32.mxu0 %v892_v62  ;;  %2878 = vmatprep.subr.bf16.mxu1 %v2877_v60 }
  0x7d   :  { %2693 = vmatprep.mubr.f32.mxu1 %v3470_v45  ;;  %2824 = vmatpush3.bf16.msk.msra.mxu0 %vm3558_vm6, %v3014_v14 }
  0x7e   :  { %2826 = vmatprep.subr.msk.bf16.mxu0 %vm3576_vm11, %v3014_v14 }
  0x7f   :  { %2547 = vmatmul.mubr.f32.gmra.mrb[6].mxu0 %v902_v20  ;;  %2880 = vmatpush3.bf16.msra.mxu1 %v2877_v60 }
  0x80   :  { %2691 = vmatprep.subr.mxu1 %v3462_v32  ;;  %2613 = vmatprep.mubr.f32.mxu0 %v1484_v46 }
  0x81   :  { %2828 = vmatpush3.bf16.msk.msra.mxu0 %vm3576_vm11, %v3014_v14 }
  0x82   :  { %2830 = vmatprep.subr.msk.bf16.mxu0 %vm3606_vm5, %v3014_v14 }
  0x83   :  { %2692 = vmatpush3.msra.mxu1 %v3462_v32 }
  0x84   :  { %2882 = vmatprep.subr.msk.bf16.mxu1 %vm3558_vm6, %v3014_v14  ;;  %2694 = vmatmul.mubr.f32.vlgmr.msra.gmra.mrb[4].mxu1 %v3509_v16 }
  0x85   :  { %2884 = vmatpush3.bf16.msk.msra.mxu1 %vm3558_vm6, %v3014_v14  ;;  %2832 = vmatpush3.bf16.msk.msra.mxu0 %vm3606_vm5, %v3014_v14 }
  0x86   :  { %2886 = vmatprep.subr.msk.bf16.mxu1 %vm3576_vm11, %v3014_v14  ;;  %2696 = vmatprep.mubr.f32.mxu1 %v3526_v18 }
  0x87   :  { %2611 = vmatprep.subr.msk.mxu0 %vm124_vm0, %v3402_v29 }
  0x88   :  { %2697 = vmatmul.mubr.f32.gmra.mrb[6].mxu1 %v3534_v33 }
  0x89   :  { %2888 = vmatpush3.bf16.msk.msra.mxu1 %vm3576_vm11, %v3014_v14  ;;  %2612 = vmatpush3.msk.msra.mxu0 %vm124_vm0, %v3402_v29 }
  0x8a   :  { %2890 = vmatprep.subr.msk.bf16.mxu1 %vm3606_vm5, %v3014_v14  ;;  %2713 = vmatprep.mubr.f32.mxu1 %v3470_v45 }
  0x8b   :  { %2614 = vmatmul.mubr.f32.vlgmr.msra.gmra.mrb[8].mxu0 %v1494_v9 }
  0x8c   :  { %2616 = vmatprep.mubr.f32.mxu0 %v1504_v52 }
  0x8d   :  { %2892 = vmatpush3.bf16.msk.msra.mxu1 %vm3606_vm5, %v3014_v14 }
  0x8e   :  { %2711 = vmatprep.subr.msk.mxu1 %vm124_vm0, %v3402_v29 }
  0x8f   :  { %2617 = vmatmul.mubr.f32.gmra.mrb[10].mxu0 %v1514_v38 }
  0x91   :  { %2712 = vmatpush3.msk.msra.mxu1 %vm124_vm0, %v3402_v29 }
  0x92   :  { %2714 = vmatmul.mubr.f32.vlgmr.msra.gmra.mrb[4].mxu1 %v3509_v16 }
  0x93   :  { %2716 = vmatprep.mubr.f32.mxu1 %v3526_v18 }
  0x96   :  { %2717 = vmatmul.mubr.f32.gmra.mrb[6].mxu1 %v3534_v33 }
 0x11f   :  { %v2595_v32 = vpop.f32.mrb[0].mxu1 }
 0x120   :  { %v1367_v45 = vpop.f32.mrb[1].mxu1 }
 0x123   :  { %v2598_v53 = vpop.f32.mrb[2].mxu1 }
 0x124   :  { %v1379_v24 = vpop.f32.mrb[3].mxu1 }
 0x146   :  { %v2535_v31 = vpop.f32.mrb[0].mxu0 }
 0x147   :  { %v2062_v14 = vmul.f32 %v2535_v31, %v2535_v31  ;;  %v759_v35 = vpop.f32.mrb[1].mxu0 }
 0x148   :  { %v2061_v47 = vmul.f32 %v759_v35, %v759_v35 }
 0x149   :  { %v2067_v57 = vsel %vm2065_vm7, %v2062_v14, 0.0 }
 0x14a   :  { %v2066_v49 = vsel %vm2065_vm7, %v2061_v47, 0.0  ;;  %v2538_v29 = vpop.f32.mrb[2].mxu0 }
 0x14b   :  { %v2068_v55 = vadd.f32 %v2067_v57, %v2066_v49  ;;  %v771_v15 = vpop.f32.mrb[3].mxu0  ;;  %v2064_v16 = vmul.f32 %v2538_v29, %v2538_v29 }
 0x14c   :  { %v2063_v36 = vmul.f32 %v771_v15, %v771_v15 }
 0x14d   :  { %v2071_v17 = vsel %vm2065_vm7, %v2064_v16, 0.0 }
 0x14e   :  { %v2069_v25 = vsel %vm2065_vm7, %v2063_v36, 0.0  ;;  %v2545_v28 = vpop.f32.mrb[4].mxu0 }
 0x14f   :  { %v2070_v40 = vadd.f32 %v2069_v25, %v2068_v55  ;;  %v2893_v0 = vadd.f32 %v2595_v32, %v2545_v28  ;;  %v874_v61 = vpop.f32.mrb[5].mxu0 }
 0x150   :  { %v2894_v18 = vadd.f32 %v1367_v45, %v874_v61 }
 0x151   :  { %v2072_v13 = vadd.f32 %v2071_v17, %v2070_v40  ;;  %v2087_v37 = vmul.f32 %v2893_v0, %v2893_v0  ;;  %v2143_v43 = vmul.f32 %v2893_v0, %v2535_v31  ;;  %v2135_v33 = vadd.f32 %v2893_v0, %v2535_v31 }
 0x152   :  { %v2086_v34 = vmul.f32 %v2894_v18, %v2894_v18  ;;  %v2142_v8 = vmul.f32 %v2894_v18, %v759_v35  ;;  %v2548_v30 = vpop.f32.mrb[6].mxu0  ;;  %v2134_v1 = vadd.f32 %v2894_v18, %v759_v35 }
 0x153   :  { %v2073_v2 = vrot.slane %v2072_v13, 4  ;;  %v2091_v3 = vsel %vm2065_vm7, %v2087_v37, 0.0  ;;  %v2895_v4 = vadd.f32 %v2598_v53, %v2548_v30  ;;  %v894_v12 = vpop.f32.mrb[7].mxu0 }
 0x154   :  { %v2090_v6 = vsel %vm2065_vm7, %v2086_v34, 0.0  ;;  %v2896_v7 = vadd.f32 %v1379_v24, %v894_v12 }
 0x155   :  { %v2074_v19 = vadd.f32 %v2073_v2, %v2072_v13  ;;  %v2092_v26 = vadd.f32 %v2091_v3, %v2090_v6  ;;  %v2089_v39 = vmul.f32 %v2895_v4, %v2895_v4  ;;  %v2145_v42 = vmul.f32 %v2895_v4, %v2538_v29 }
 0x156   :  { %v2088_v5 = vmul.f32 %v2896_v7, %v2896_v7  ;;  %v2144_v41 = vmul.f32 %v2896_v7, %v771_v15  ;;  %v2137_v48 = vadd.f32 %v2895_v4, %v2538_v29  ;;  %v2136_v50 = vadd.f32 %v2896_v7, %v771_v15 }
 0x157   :  { %v2075_v54 = vrot.slane %v2074_v19, 2  ;;  %v2095_v51 = vsel %vm2065_vm7, %v2089_v39, 0.0 }
 0x158   :  { %v2093_v27 = vsel %vm2065_vm7, %v2088_v5, 0.0 }
 0x159   :  { %v2076_v23 = vadd.f32 %v2075_v54, %v2074_v19  ;;  %v2094_v11 = vadd.f32 %v2093_v27, %v2092_v26 }
 0x15b   :  { %v2077_v59 = vrot.slane %v2076_v23, 1  ;;  %v2096_v10 = vadd.f32 %v2095_v51, %v2094_v11 }
 0x15d   :  { %v2097_v56 = vrot.slane %v2096_v10, 4  ;;  %v2078_v44 = vadd.f32 %v2077_v59, %v2076_v23 }
 0x15e   :  { %v2615_v62 = vpop.f32.mrb[8].mxu0 }
 0x15f   :  { %v2098_v60 = vadd.f32 %v2097_v56, %v2096_v10  ;;  %v1486_v22 = vpop.f32.mrb[9].mxu0  ;;  %2958 = vrsqrt.f32 %v2078_v44  ;;  %vm2081_vm0 = vcmp.eq.f32.partialorder %v2078_v44, inf  ;;  %v2084_v39 = vand.u32 2147483648, %v2078_v44 }
 0x160   :  { %vm2083_vm13 = vcmp.eq.f32.partialorder %v2078_v44, 0.0 }
 0x161   :  { %v2099_v20 = vrot.slane %v2098_v60, 2 }
 0x162   :  { %v2618_v46 = vpop.f32.mrb[10].mxu0 }
 0x163   :  { %v2100_v63 = vadd.f32 %v2099_v20, %v2098_v60  ;;  %v1506_v58 = vpop.f32.mrb[11].mxu0 }
 0x165   :  { %v2101_v9 = vrot.slane %v2100_v63, 1  ;;  %v2715_v21 = vpop.f32.mrb[4].mxu1 }
 0x166   :  { %v2897_v52 = vadd.f32 %v2715_v21, %v2615_v62  ;;  %v2039_v38 = vpop.f32.mrb[5].mxu1 }
 0x167   :  { %v2102_v32 = vadd.f32 %v2101_v9, %v2100_v63  ;;  %v2898_v45 = vadd.f32 %v2039_v38, %v1486_v22 }
 0x168   :  { %v2111_v53 = vmul.f32 %v2897_v52, %v2897_v52  ;;  %v2139_v24 = vmul.f32 %v2897_v52, %v2135_v33 }
 0x169   :  { %v2110_v31 = vmul.f32 %v2898_v45, %v2898_v45  ;;  %v2138_v14 = vmul.f32 %v2898_v45, %v2134_v1  ;;  %v2718_v35 = vpop.f32.mrb[6].mxu1  ;;  %2960 = vrsqrt.f32 %v2102_v32  ;;  %v2959_v40 = vpop.eup %2958  ;;  %vm2105_vm12 = vcmp.eq.f32.partialorder %v2102_v32, inf }
 0x16a   :  { %v2115_v47 = vsel %vm2065_vm7, %v2111_v53, 0.0  ;;  %v2147_v57 = vsub.f32 %v2139_v24, %v2143_v43  ;;  %v2899_v49 = vadd.f32 %v2718_v35, %v2618_v46  ;;  %v2051_v29 = vpop.f32.mrb[7].mxu1  ;;  %v2080_v30 = vmul.f32 %v2959_v40, %v2078_v44 }
 0x16b   :  { %v2114_v55 = vsel %vm2065_vm7, %v2110_v31, 0.0  ;;  %v2146_v15 = vsub.f32 %v2138_v14, %v2142_v8  ;;  %v2900_v16 = vadd.f32 %v2051_v29, %v1506_v58  ;;  %vm2107_vm14 = vcmp.eq.f32.partialorder %v2102_v32, 0.0 }
 0x16c   :  { %v2151_v36 = vsel %vm2065_vm7, %v2147_v57, 0.0  ;;  %v2116_v25 = vadd.f32 %v2115_v47, %v2114_v55  ;;  %v2141_v28 = vmul.f32 %v2899_v49, %v2137_v48  ;;  %v2113_v61 = vmul.f32 %v2899_v49, %v2899_v49 }
 0x16d   :  { %v2150_v0 = vsel %vm2065_vm7, %v2146_v15, 0.0  ;;  %v2112_v17 = vmul.f32 %v2900_v16, %v2900_v16  ;;  %v2140_v18 = vmul.f32 %v2900_v16, %v2136_v50  ;;  %v2082_v19 = vsel %vm2081_vm0, %v2078_v44, %v2080_v30 }
 0x16e   :  { %v2152_v13 = vadd.f32 %v2151_v36, %v2150_v0  ;;  %v2149_v37 = vsub.f32 %v2141_v28, %v2145_v42  ;;  %v2119_v8 = vsel %vm2065_vm7, %v2113_v61, 0.0  ;;  %v2108_v42 = vand.u32 2147483648, %v2102_v32 }
 0x16f   :  { %v2117_v43 = vsel %vm2065_vm7, %v2112_v17, 0.0  ;;  %v2148_v33 = vsub.f32 %v2140_v18, %v2144_v41  ;;  %v2085_v50 = vsel %vm2083_vm13, %v2084_v39, %v2082_v19 }
 0x170   :  { %v2118_v34 = vadd.f32 %v2117_v43, %v2116_v25  ;;  %v2155_v12 = vsel %vm2065_vm7, %v2149_v37, 0.0 }
 0x171   :  { %v2153_v1 = vsel %vm2065_vm7, %v2148_v33, 0.0 }
 0x172   :  { %v2120_v2 = vadd.f32 %v2119_v8, %v2118_v34  ;;  %v2154_v3 = vadd.f32 %v2153_v1, %v2152_v13 }
 0x173   :  { %v2961_v4 = vpop.eup %2960 }
 0x174   :  { %v2121_v6 = vrot.slane %v2120_v2, 4  ;;  %v2156_v7 = vadd.f32 %v2155_v12, %v2154_v3  ;;  %v2104_v26 = vmul.f32 %v2961_v4, %v2102_v32 }
 0x176   :  { %v2122_v5 = vadd.f32 %v2121_v6, %v2120_v2  ;;  %v2106_v41 = vsel %vm2105_vm12, %v2102_v32, %v2104_v26  ;;  %v2157_v48 = vrot.slane %v2156_v7, 4 }
 0x177   :  { %v2109_v54 = vsel %vm2107_vm14, %v2108_v42, %v2106_v41 }
 0x178   :  { %v2123_v27 = vrot.slane %v2122_v5, 2  ;;  %v2163_v23 = vadd.f32 %v2109_v54, %v2085_v50  ;;  %v2158_v51 = vadd.f32 %v2157_v48, %v2156_v7 }
 0x17a   :  { %v2124_v11 = vadd.f32 %v2123_v27, %v2122_v5  ;;  %v2159_v56 = vrot.slane %v2158_v51, 2 }
 0x17c   :  { %v2125_v59 = vrot.slane %v2124_v11, 1  ;;  %v2160_v62 = vadd.f32 %v2159_v56, %v2158_v51 }
 0x17e   :  { %v2126_v10 = vadd.f32 %v2125_v59, %v2124_v11  ;;  %v2161_v60 = vrot.slane %v2160_v62, 1 }
 0x180   :  { %2962 = vrsqrt.f32 %v2126_v10  ;;  %v2162_v46 = vadd.f32 %v2161_v60, %v2160_v62  ;;  %vm2129_vm15 = vcmp.eq.f32.partialorder %v2126_v10, inf  ;;  %v2132_v44 = vand.u32 2147483648, %v2126_v10 }
 0x181   :  { %vm2131_vm1 = vcmp.eq.f32.partialorder %v2126_v10, 0.0 }
 0x182   :  { %v2165_v21 = vmul.f32 2.0, %v2162_v46 }
 0x18a   :  { %v2963_v22 = vpop.eup %2962 }
 0x18b   :  { %v2128_v20 = vmul.f32 %v2963_v22, %v2126_v10 }
 0x18d   :  { %v2130_v63 = vsel %vm2129_vm15, %v2126_v10, %v2128_v20 }
 0x18e   :  { %v2133_v58 = vsel %vm2131_vm1, %v2132_v44, %v2130_v63 }
 0x18f   :  { %v2164_v9 = vadd.f32 %v2163_v23, %v2133_v58 }
 0x191   :  { %v2166_v52 = vsub.f32 %v2164_v9, %v2165_v21 }
 0x193   :  { %2168 = vst.msk [vmem:[#allocation5] sm:$0x1] %vm2167_vm2, %v2166_v52 }
 0x194   :  { %2997 = shalt.err (!%p2994_p12)
}
 0x195   :  { %s2998_s0 = scalar_lea.hbm %s3765_s6, 16 }
 0x196   :  { %p2999_p13 = scmp.ne.s32.totalorder %s3765_s6, %s2998_s0  ;;  %p3002_p0 = scmp.lt.u32.totalorder %s2998_s0, %s3765_s6 }
 0x198   :  { %p3004_p1 = pnand %p3002_p0, %p2999_p13 }
 0x19a   :  { %3007 = shalt.err (!%p3004_p1)
}
 0x19b   :  { %2178 = dma.vmem_to_hbm [thread:$0]  %s2176_s9, 16, %s3765_s6, [#allocation4]  }
 0x19c   :  { %3010 = dma.done.wait [#allocation4], 16  }
 0x19d   :  { %3011 = vsyncadd [#allocation4], 4294967280 }
 0x19e   :  { %2182 = vsyncpa [#allocation3], 1 }
 0x19f   :  { %2183 = vsyncpa [#allocation4], 1 }

</bundles_post_ra>
